<compile_context>
chip_gen: v5e
topology: v5e:2x2
jax: 0.10.0
libtpu: 0.0.40
codegen_flags: <defaults>
</compile_context>

<pallas_src>
import jax
import jax.numpy as jnp
import numpy as np
from jax import lax
from jax.experimental import pallas as pl
from jax.experimental.pallas import tpu as pltpu


# ----------------------------- config ---------------------------------------
BATCH = 2
SEQ = 16
HIDDEN = 128      # hidden_size (input features of self.layer)
ALL_HEAD = 128    # all_head_size (output features of self.layer)


# ----------------------------- kernels ---------------------------------------
def qkv_plain_kernel(h_ref,      # VMEM (T, Hin)   bf16 token block (all tokens)
                     wt_ref,     # VMEM (Hin, Hout) bf16 layer.weight.T (resident)
                     bias_ref,   # VMEM (1, Hout)  f32
                     out_ref):   # VMEM (T, Hout)
    acc = jnp.dot(h_ref[...], wt_ref[...],
                  preferred_element_type=jnp.float32)           # (T, Hout) f32
    out_ref[...] = (acc + bias_ref[...]).astype(out_ref.dtype)


def qkv_latent_kernel(h_ref,      # VMEM (B, S, Hin)  bf16 hidden states (all)
                      wt_ref,     # VMEM (Hin, Hout)  bf16 layer.weight.T
                      z_ref,      # VMEM (B, Hin)     f32  proj_latent[:, 1:]
                      alpha_ref,  # VMEM (1, Hout)    f32
                      bias_ref,   # VMEM (1, Hout)    f32
                      out_ref):   # VMEM (B, S, Hout)
    B, S, Hin = h_ref.shape
    Hout = out_ref.shape[-1]

    h = h_ref[...]                                              # (B, S, Hin) bf16
    # Shared path: one big (B*S, Hin) @ (Hin, Hout) matmul on the MXU, f32 acc.
    base = jnp.dot(h.reshape(B * S, Hin), wt_ref[...],
                   preferred_element_type=jnp.float32)          # (B*S, Hout)
    base = base.reshape(B, S, Hout)

    z = z_ref[...]                                              # (B, Hin) f32
    # Gate computed in-kernel (EUP): g_b = sigmoid(z[b, 0]).
    g = jax.nn.sigmoid(z[:, 0:1])[:, :, None]                   # (B, 1, 1) f32

    # Rank-1 latent path: (h . z_b) * alpha^T — the per-batch predicted matrix
    # z_b alpha^T is never materialized.
    dotz = jnp.sum(h.astype(jnp.float32) * z[:, None, :],
                   axis=-1, keepdims=True)                      # (B, S, 1) f32

    out = (1.0 - g) * base + (g * dotz) * alpha_ref[...] + bias_ref[...]
    out_ref[...] = out.astype(out_ref.dtype)


# ----------------------------- wrapper ---------------------------------------
def query_key_value_layer(hidden_states, weight, bias,
                          alpha=None, proj_latent=None,
                          add_latent_w_matrix_influence=False):
    """Forward pass of QueryKeyValueLayer.

    hidden_states: [B, S, Hin]   weight: [Hout, Hin]   bias: [Hout]
    alpha: [Hout]                proj_latent: [B, Hin + 1]
    """
    B, S, Hin = hidden_states.shape
    Hout, Hin_w = weight.shape
    assert Hin == Hin_w

    # MXU operands in bf16 (native format on v5e/v6e/v7x; halves DMA bytes).
    # Accumulation and the gated combine stay in f32 inside the kernels.
    h_bf16 = hidden_states.astype(jnp.bfloat16)
    wt_bf16 = weight.T.astype(jnp.bfloat16)                     # (Hin, Hout)
    bias2d = bias.astype(jnp.float32).reshape(1, Hout)
    out_dtype = hidden_states.dtype

    if not add_latent_w_matrix_influence:
        # Plain nn.Linear: all B*S tokens in ONE grid step (lane-dense store).
        tokens = B * S
        h2 = h_bf16.reshape(tokens, Hin)
        out2 = pl.pallas_call(
            qkv_plain_kernel,
            out_shape=jax.ShapeDtypeStruct((tokens, Hout), out_dtype),
            grid_spec=pltpu.PrefetchScalarGridSpec(
                num_scalar_prefetch=0,
                grid=(1,),
                in_specs=[
                    pl.BlockSpec((tokens, Hin), lambda i: (0, 0)),
                    pl.BlockSpec((Hin, Hout), lambda i: (0, 0)),
                    pl.BlockSpec((1, Hout), lambda i: (0, 0)),
                ],
                out_specs=pl.BlockSpec((tokens, Hout), lambda i: (0, 0)),
            ),
            compiler_params=pltpu.CompilerParams(
                dimension_semantics=("arbitrary",)),
        )(h2, wt_bf16, bias2d)
        return out2.reshape(B, S, Hout)

    # ---- latent-influence path (single grid step over the whole batch) ----
    assert proj_latent is not None and alpha is not None
    z = proj_latent[:, 1:].astype(jnp.float32)                  # (B, Hin)
    alpha2d = alpha.astype(jnp.float32).reshape(1, Hout)

    out = pl.pallas_call(
        qkv_latent_kernel,
        out_shape=jax.ShapeDtypeStruct((B, S, Hout), out_dtype),
        grid_spec=pltpu.PrefetchScalarGridSpec(
            num_scalar_prefetch=0,
            grid=(1,),
            in_specs=[
                pl.BlockSpec((B, S, Hin), lambda i: (0, 0, 0)),
                pl.BlockSpec((Hin, Hout), lambda i: (0, 0)),
                pl.BlockSpec((B, Hin), lambda i: (0, 0)),
                pl.BlockSpec((1, Hout), lambda i: (0, 0)),
                pl.BlockSpec((1, Hout), lambda i: (0, 0)),
            ],
            out_specs=pl.BlockSpec((B, S, Hout), lambda i: (0, 0, 0)),
        ),
        compiler_params=pltpu.CompilerParams(
            dimension_semantics=("arbitrary",)),
    )(h_bf16, wt_bf16, z, alpha2d, bias2d)
    return out


def fused_query_key_value(hidden_states, weights, biases,
                          alphas=None, proj_latent=None,
                          add_latent_w_matrix_influence=False):
    """Fuse the Q, K and V projections into ONE pallas_call by concatenating
    the three weight matrices along the output axis (Hin x 3*Hout).  The
    factorized latent math is identical per output column, so the same kernels
    are reused with a 3x wider (lane-dense) output block."""
    Hout = weights[0].shape[0]
    w_cat = jnp.concatenate(weights, axis=0)                    # (3*Hout, Hin)
    b_cat = jnp.concatenate(biases, axis=0)                     # (3*Hout,)
    a_cat = jnp.concatenate(alphas, axis=0) if alphas is not None else None
    out = query_key_value_layer(
        hidden_states, w_cat, b_cat, alpha=a_cat, proj_latent=proj_latent,
        add_latent_w_matrix_influence=add_latent_w_matrix_influence)
    return out[..., :Hout], out[..., Hout:2 * Hout], out[..., 2 * Hout:]


# ----------------------------- references (plain JAX) -------------------------
def qkv_ref_plain(h, weight, bias):
    return jnp.einsum('bsi,oi->bso', h, weight,
                      precision=lax.Precision.HIGHEST) + bias


def qkv_ref_latent(h, weight, bias, alpha, proj_latent):
    # Literal translation of the PyTorch math (materializes per-batch matrices).
    z = proj_latent[:, 1:]
    g = jax.nn.sigmoid(z[:, 0])
    pred = z[:, :, None] * alpha[None, None, :]                  # (B, Hin, Hout)
    normal = jnp.broadcast_to(weight.T[None], pred.shape)        # (B, Hin, Hout)
    gm = g[:, None, None]
    wm = (1.0 - gm) * normal + gm * pred
    return jnp.einsum('bsi,bio->bso', h, wm,
                      precision=lax.Precision.HIGHEST) + bias


# ----------------------------- main ------------------------------------------
if __name__ == "__main__":
    key = jax.random.PRNGKey(0)
    k_h, k_w, k_b, k_a, k_z = jax.random.split(key, 5)

    def bf16_round(x):
        # Keep values exactly bf16-representable so the bf16 MXU path is exact
        # and the comparison against the f32 reference is tight.
        return x.astype(jnp.bfloat16).astype(jnp.float32)

    hidden_states = bf16_round(jax.random.normal(k_h, (BATCH, SEQ, HIDDEN),
                                                 jnp.float32))
    weight = bf16_round(0.02 * jax.random.normal(k_w, (ALL_HEAD, HIDDEN),
                                                 jnp.float32))
    bias = bf16_round(0.02 * jax.random.normal(k_b, (ALL_HEAD,), jnp.float32))
    # alpha is zero-initialized in the module; use random values here so the
    # latent path is actually exercised by the test.
    alpha = bf16_round(0.02 * jax.random.normal(k_a, (ALL_HEAD,), jnp.float32))
    proj_latent = bf16_round(jax.random.normal(k_z, (BATCH, HIDDEN + 1),
                                               jnp.float32))

    # latent-influence path (single-step grid, bf16 MXU, in-kernel gate)
    out_lat = query_key_value_layer(hidden_states, weight, bias,
                                    alpha=alpha, proj_latent=proj_latent,
                                    add_latent_w_matrix_influence=True)
    out_lat = jax.block_until_ready(out_lat)
    ref_lat = qkv_ref_latent(hidden_states, weight, bias, alpha, proj_latent)
    np.testing.assert_allclose(np.asarray(out_lat), np.asarray(ref_lat),
                               rtol=1e-4, atol=1e-4)

    # plain nn.Linear path (single-step grid)
    out_plain = query_key_value_layer(hidden_states, weight, bias,
                                      add_latent_w_matrix_influence=False)
    out_plain = jax.block_until_ready(out_plain)
    ref_plain = qkv_ref_plain(hidden_states, weight, bias)
    np.testing.assert_allclose(np.asarray(out_plain), np.asarray(ref_plain),
                               rtol=1e-4, atol=1e-4)

    # fused Q/K/V (three projections, one pallas_call, 384-lane output)
    kq, kk, kv, kaq, kak, kav = jax.random.split(jax.random.PRNGKey(1), 6)
    ws = [bf16_round(0.02 * jax.random.normal(k, (ALL_HEAD, HIDDEN),
                                              jnp.float32)) for k in (kq, kk, kv)]
    bs = [bias, bf16_round(bias * 0.5), bf16_round(-bias)]
    als = [bf16_round(0.02 * jax.random.normal(k, (ALL_HEAD,), jnp.float32))
           for k in (kaq, kak, kav)]
    q_o, k_o, v_o = fused_query_key_value(hidden_states, ws, bs, alphas=als,
                                          proj_latent=proj_latent,
                                          add_latent_w_matrix_influence=True)
    q_o = jax.block_until_ready(q_o)
    for got, w_i, b_i, a_i in zip((q_o, k_o, v_o), ws, bs, als):
        ref_i = qkv_ref_latent(hidden_states, w_i, b_i, a_i, proj_latent)
        np.testing.assert_allclose(np.asarray(got), np.asarray(ref_i),
                                   rtol=1e-4, atol=1e-4)

    print("KERNEL_OK")
</pallas_src>

<mosaic_0001>
module attributes {stable_mosaic.version = 11 : i64} {
  func.func @qkv_latent_kernel(%arg0: i32, %arg1: memref<2x16x128xbf16, #tpu.memory_space<vmem>>, %arg2: memref<128x128xbf16, #tpu.memory_space<vmem>>, %arg3: memref<2x128xf32, #tpu.memory_space<vmem>>, %arg4: memref<1x128xf32, #tpu.memory_space<vmem>>, %arg5: memref<1x128xf32, #tpu.memory_space<vmem>>, %arg6: memref<2x16x128xf32, #tpu.memory_space<vmem>>) attributes {dimension_semantics = [#tpu.dimension_semantics<arbitrary>], iteration_bounds = array<i64: 1>, scalar_prefetch = 0 : i64, scratch_operands = 0 : i64, tpu.core_type = #tpu.core_type<tc>, window_params = [{pipeline_mode = #tpu.pipeline_mode<synchronous>, transform_indices = @transform_0, window_bounds = array<i64: 2, 16, 128>}, {pipeline_mode = #tpu.pipeline_mode<synchronous>, transform_indices = @transform_1, window_bounds = array<i64: 128, 128>}, {pipeline_mode = #tpu.pipeline_mode<synchronous>, transform_indices = @transform_2, window_bounds = array<i64: 2, 128>}, {pipeline_mode = #tpu.pipeline_mode<synchronous>, transform_indices = @transform_3, window_bounds = array<i64: 1, 128>}, {pipeline_mode = #tpu.pipeline_mode<synchronous>, transform_indices = @transform_4, window_bounds = array<i64: 1, 128>}, {pipeline_mode = #tpu.pipeline_mode<synchronous>, transform_indices = @transform_5, window_bounds = array<i64: 2, 16, 128>}]} {
    %c0 = arith.constant 0 : index
    %c0_0 = arith.constant 0 : index
    %c0_1 = arith.constant 0 : index
    %0 = vector.load %arg1[%c0, %c0_0, %c0_1] : memref<2x16x128xbf16, #tpu.memory_space<vmem>>, vector<2x16x128xbf16>
    %1 = vector.shape_cast %0 : vector<2x16x128xbf16> to vector<32x128xbf16>
    %c0_2 = arith.constant 0 : index
    %c0_3 = arith.constant 0 : index
    %2 = vector.load %arg2[%c0_2, %c0_3] : memref<128x128xbf16, #tpu.memory_space<vmem>>, vector<128x128xbf16>
    %cst = arith.constant dense<0.000000e+00> : vector<32x128xf32>
    %3 = tpu.matmul %1, %2, %cst {dimension_numbers = #tpu.dot_dimension_numbers<[1], [0], [0], [1], [0, 0, 1, 1], [], []>} : vector<32x128xbf16>, vector<128x128xbf16>, vector<32x128xf32> -> vector<32x128xf32>
    %4 = vector.shape_cast %3 : vector<32x128xf32> to vector<2x16x128xf32>
    %c0_4 = arith.constant 0 : index
    %c0_5 = arith.constant 0 : index
    %5 = vector.load %arg3[%c0_4, %c0_5] : memref<2x128xf32, #tpu.memory_space<vmem>>, vector<2x128xf32>
    %6 = vector.extract_strided_slice %5 {offsets = [0, 0], sizes = [2, 1], strides = [1, 1]} : vector<2x128xf32> to vector<2x1xf32>
    %7 = arith.negf %6 : vector<2x1xf32>
    %8 = math.exp %7 : vector<2x1xf32>
    %cst_6 = arith.constant 1.000000e+00 : f32
    %9 = vector.broadcast %cst_6 : f32 to vector<2x1xf32>
    %10 = arith.addf %9, %8 : vector<2x1xf32>
    %11 = arith.divf %9, %10 : vector<2x1xf32>
    %12 = vector.shape_cast %11 : vector<2x1xf32> to vector<2x1x1xf32>
    %13 = arith.extf %0 : vector<2x16x128xbf16> to vector<2x16x128xf32>
    %14 = vector.shape_cast %5 : vector<2x128xf32> to vector<2x1x128xf32>
    %15 = vector.broadcast %14 : vector<2x1x128xf32> to vector<2x16x128xf32>
    %16 = arith.mulf %13, %15 : vector<2x16x128xf32>
    %cst_7 = arith.constant dense<0.000000e+00> : vector<2x16xf32>
    %17 = vector.multi_reduction <add>, %16, %cst_7 [2] : vector<2x16x128xf32> to vector<2x16xf32>
    %18 = vector.shape_cast %17 : vector<2x16xf32> to vector<2x16x1xf32>
    %cst_8 = arith.constant 1.000000e+00 : f32
    %19 = vector.broadcast %cst_8 : f32 to vector<2x1x1xf32>
    %20 = arith.subf %19, %12 : vector<2x1x1xf32>
    %21 = vector.broadcast %20 : vector<2x1x1xf32> to vector<2x16x128xf32>
    %22 = arith.mulf %21, %4 : vector<2x16x128xf32>
    %23 = vector.broadcast %12 : vector<2x1x1xf32> to vector<2x16x1xf32>
    %24 = arith.mulf %23, %18 : vector<2x16x1xf32>
    %c0_9 = arith.constant 0 : index
    %c0_10 = arith.constant 0 : index
    %25 = vector.load %arg4[%c0_9, %c0_10] : memref<1x128xf32, #tpu.memory_space<vmem>>, vector<1x128xf32>
    %26 = vector.shape_cast %25 : vector<1x128xf32> to vector<1x1x128xf32>
    %27 = vector.broadcast %24 : vector<2x16x1xf32> to vector<2x16x128xf32>
    %28 = vector.broadcast %26 : vector<1x1x128xf32> to vector<2x16x128xf32>
    %29 = arith.mulf %27, %28 : vector<2x16x128xf32>
    %30 = arith.addf %22, %29 : vector<2x16x128xf32>
    %c0_11 = arith.constant 0 : index
    %c0_12 = arith.constant 0 : index
    %31 = vector.load %arg5[%c0_11, %c0_12] : memref<1x128xf32, #tpu.memory_space<vmem>>, vector<1x128xf32>
    %32 = vector.shape_cast %31 : vector<1x128xf32> to vector<1x1x128xf32>
    %33 = vector.broadcast %32 : vector<1x1x128xf32> to vector<2x16x128xf32>
    %34 = arith.addf %30, %33 : vector<2x16x128xf32>
    %c0_13 = arith.constant 0 : index
    %c0_14 = arith.constant 0 : index
    %c0_15 = arith.constant 0 : index
    %35 = vector.load %arg6[%c0_13, %c0_14, %c0_15] : memref<2x16x128xf32, #tpu.memory_space<vmem>>, vector<2x16x128xf32>
    tpu.vector_store %arg6[%c0_13, %c0_14, %c0_15], %34 {strides = array<i32>} : memref<2x16x128xf32, #tpu.memory_space<vmem>>, vector<2x16x128xf32>,
    return
  }
  func.func @transform_0(%arg0: i32) -> (i32, i32, i32) {
    %c0_i32 = arith.constant 0 : i32
    %c0_i32_0 = arith.constant 0 : i32
    %c0_i32_1 = arith.constant 0 : i32
    %c0_i32_2 = arith.constant 0 : i32
    return %c0_i32, %c0_i32_0, %c0_i32_1 : i32, i32, i32
  }
  func.func @transform_1(%arg0: i32) -> (i32, i32) {
    %c0_i32 = arith.constant 0 : i32
    %c0_i32_0 = arith.constant 0 : i32
    %c0_i32_1 = arith.constant 0 : i32
    return %c0_i32, %c0_i32_0 : i32, i32
  }
  func.func @transform_2(%arg0: i32) -> (i32, i32) {
    %c0_i32 = arith.constant 0 : i32
    %c0_i32_0 = arith.constant 0 : i32
    %c0_i32_1 = arith.constant 0 : i32
    return %c0_i32, %c0_i32_0 : i32, i32
  }
  func.func @transform_3(%arg0: i32) -> (i32, i32) {
    %c0_i32 = arith.constant 0 : i32
    %c0_i32_0 = arith.constant 0 : i32
    %c0_i32_1 = arith.constant 0 : i32
    return %c0_i32, %c0_i32_0 : i32, i32
  }
  func.func @transform_4(%arg0: i32) -> (i32, i32) {
    %c0_i32 = arith.constant 0 : i32
    %c0_i32_0 = arith.constant 0 : i32
    %c0_i32_1 = arith.constant 0 : i32
    return %c0_i32, %c0_i32_0 : i32, i32
  }
  func.func @transform_5(%arg0: i32) -> (i32, i32, i32) {
    %c0_i32 = arith.constant 0 : i32
    %c0_i32_0 = arith.constant 0 : i32
    %c0_i32_1 = arith.constant 0 : i32
    %c0_i32_2 = arith.constant 0 : i32
    return %c0_i32, %c0_i32_0, %c0_i32_1 : i32, i32, i32
  }
}

</mosaic_0001>

<bundles_post_ra>
// kernel: tpu_custom_call.1
= control target key start
LH: loop header
LB: loop body
LE: loop exit
PB: predicated region body
PF: predicated region fallthrough
CT: control target
= control target key end

     0   :  { %10 = vsyncpa [#allocation3], 0  ;;  %s536_s0 = inlined_call_operand.hbm [shape: bf16[2,16,128], index: 0, kind: input, shape index: {}]   ;;  %s537_s1 = inlined_call_operand.hbm [shape: bf16[128,128], index: 1, kind: input, shape index: {}]   ;;  %s538_s2 = inlined_call_operand.hbm [shape: f32[2,128], index: 2, kind: input, shape index: {}]   ;;  %s539_s3 = inlined_call_operand.vmem [shape: f32[1,128], index: 3, kind: input, shape index: {}]   ;;  %s540_s4 = inlined_call_operand.vmem [shape: f32[1,128], index: 4, kind: input, shape index: {}]   ;;  %s541_s5 = inlined_call_operand.hbm [shape: f32[2,16,128], index: 5, kind: output, shape index: {}]  }
   0x1   :  { %11 = vsyncpa [#allocation6], 0 }
   0x2   :  { %12 = vsyncpa [#allocation4], 0  ;;  %s30_s20 = sshll.u32 %s537_s1, 4  ;;  %s479_s21 = smov [#allocation5]   ;;  %s31_s20 = int_to_ptr.hbm [resolvable:$true] %s30_s20 }
   0x3   :  { %s32_s22 = sshll.u32 %s479_s21, 4  ;;  %s17_s25 = sshll.u32 %s536_s0, 4  ;;  %s33_s22 = int_to_ptr.vmem [resolvable:$true] %s32_s22  ;;  %s18_s25 = int_to_ptr.hbm [resolvable:$true] %s17_s25 }
   0x4   :  { %s480_s26 = smov 64   ;;  %s481_s27 = smov 4  }
   0x5   :  { %38 = dma.hbm_to_vmem [thread:$0]  %s31_s20, 1024, %s33_s22, [#allocation6], %s480_s26, %s480_s26, %s481_s27  }
   0x6   :  { %s482_s28 = smov [#allocation2]   ;;  %s44_s7 = sshll.u32 %s538_s2, 4  ;;  %s45_s7 = int_to_ptr.hbm [resolvable:$true] %s44_s7 }
   0x7   :  { %s19_s29 = sshll.u32 %s482_s28, 4  ;;  %s483_s1 = smov [#allocation7]   ;;  %s20_s29 = int_to_ptr.vmem [resolvable:$true] %s19_s29 }
   0x8   :  { %25 = dma.hbm_to_vmem [thread:$0]  %s18_s25, 256, %s20_s29, [#allocation3], %s480_s26, %s480_s26, %s481_s27  }
   0x9   :  { %s46_s8 = sshll.u32 %s483_s1, 4  ;;  %s47_s8 = int_to_ptr.vmem [resolvable:$true] %s46_s8 }
   0xa   :  { %49 = dma.hbm_to_vmem [thread:$0]  %s45_s7, 32, %s47_s8, [#allocation6]  }
   0xb   :  { %473 = dma.done.wait [#allocation3], 256  }
   0xc   :  { %474 = vsyncadd [#allocation3], 4294967040 }
   0xd   :  { %475 = dma.done.wait [#allocation6], 1056  }
   0xe   :  { %476 = vsyncadd [#allocation6], 4294966240  ;;  %v66_v0 = vld [vmem:[#allocation2] sm:$0xff]   ;;  %v165_v1 = vld [vmem:[#allocation7] sm:$0x3]  ;;  %v484_v12 = vmov 0  }
   0xf   :  { %v68_v2 = vld [vmem:[#allocation2 + $0x8] sm:$0xff]   ;;  %v340_v3 = vmul.f32 -1.442695, %v165_v1  ;;  %v188_v4 = vunpack.c.l.bf16 %v66_v0  ;;  %v194_v5 = vperm.slane %v165_v1, 0  ;;  %v193_v8 = vrot.slane %v165_v1, 1  ;;  %v349_v10 = vld [vmem:[#allocation5 + $0x30] sm:$0xff]  ;;  %368 = vset.pattern.permute.xlu2 %v484_v12  ;;  %369 = vset.pattern.permute.xlu0 %v484_v12 }
  0x10   :  { %v350_v6 = vld [vmem:[#allocation5 + $0x38] sm:$0xff]  ;;  %v190_v7 = vunpack.c.l.bf16 %v68_v2  ;;  %v189_v13 = vunpack.c.h.bf16 %v66_v0  ;;  %370 = vset.pattern.permute.xlu1 %v484_v12  ;;  %v348_v15 = vld [vmem:[#allocation5 + $0x28] sm:$0xff]  ;;  %v191_v16 = vunpack.c.h.bf16 %v68_v2  ;;  %v347_v20 = vld [vmem:[#allocation5 + $0x20] sm:$0xff]  ;;  %s286_s13 = sshll.u32 %s541_s5, 4  ;;  %s486_s14 = smov 128   ;;  %s287_s13 = int_to_ptr.hbm [resolvable:$true] %s286_s13 }
  0x11   :  { %373 = vpow2.f32 %v340_v3  ;;  %v198_v9 = vmul.f32 %v194_v5, %v188_v4  ;;  %146 = vmatpush.bf16.msra.mxu0 %v350_v6  ;;  %351 = vmatpush.bf16.msra.mxu1 %v350_v6  ;;  %v195_v11 = vperm.slane %v193_v8, 0  ;;  %v346_v22 = vld [vmem:[#allocation5 + $0x18] sm:$0xff]  ;;  %v345_v24 = vld [vmem:[#allocation5 + $0x10] sm:$0xff]  ;;  %v344_v29 = vld [vmem:[#allocation5 + $0x8] sm:$0xff]  ;;  %s487_s15 = smov 8  }
  0x12   :  { %v199_v18 = vmul.f32 %v194_v5, %v189_v13  ;;  %v343_v33 = vld [vmem:[#allocation5] sm:$0xff]  ;;  %v341_v38 = vld [vmem:[#allocation2] sm:$0xff]  ;;  %v342_v39 = vld [vmem:[#allocation2 + $0x8] sm:$0xff] }
  0x13   :  { %202 = vadd.xlane.f32.xlu0 %v198_v9  ;;  %v200_v14 = vmul.f32 %v195_v11, %v190_v7  ;;  %v201_v21 = vmul.f32 %v195_v11, %v191_v16  ;;  %v371_v56 = vld [vmem:[%s539_s3] ss:$0 sm:$0xff]  ;;  %s485_s3 = smov [#allocation8]  }
  0x14   :  { %v372_v59 = vld [vmem:[%s540_s4] ss:$0 sm:$0xff]  ;;  %s284_s4 = sshll.u32 %s485_s3, 4  ;;  %s285_s4 = int_to_ptr.vmem [resolvable:$true] %s284_s4 }
  0x15   :  { %147 = vmatpush.bf16.msra.mxu0 %v349_v10  ;;  %352 = vmatpush.bf16.msra.mxu1 %v349_v10 }
  0x16   :  { %206 = vadd.xlane.f32.xlu1 %v200_v14 }
  0x17   :  { %v374_v17 = vpop.eup %373 }
  0x18   :  { %v169_v19 = vadd.f32 1.0, %v374_v17 }
  0x19   :  { %148 = vmatpush.bf16.msra.mxu0 %v348_v15  ;;  %353 = vmatpush.bf16.msra.mxu1 %v348_v15 }
  0x1a   :  { %375 = vrcp.f32 %v169_v19  ;;  %v181_v26 = vand.u32 2147483648, %v169_v19  ;;  %vm175_vm0 = vweird.f32 %v169_v19  ;;  %v179_v28 = vand.u32 2147483647, %v169_v19 }
  0x1b   :  { %204 = vadd.xlane.f32.xlu0 %v199_v18 }
  0x1c   :  { %v182_v31 = vor.u32 1.1754944e-38, %v181_v26  ;;  %vm180_vm3 = vcmp.eq.f32.partialorder %v179_v28, 8.507059e+37 }
  0x1d   :  { %149 = vmatpush.bf16.msra.mxu0 %v347_v20  ;;  %354 = vmatpush.bf16.msra.mxu1 %v347_v20 }
  0x1e   :  { %208 = vadd.xlane.f32.xlu1 %v201_v21 }
  0x20   :  { %v376_v23 = vpop.eup %375 }
  0x21   :  { %150 = vmatpush.bf16.msra.mxu0 %v346_v22  ;;  %355 = vmatpush.bf16.msra.mxu1 %v346_v22  ;;  %v171_v25 = vmul.f32 %v376_v23, %v169_v19  ;;  %vm176_vm1 = vweird.f32 %v376_v23 }
  0x22   :  { %vm177_vm2 = vmor %vm175_vm0, %vm176_vm1 }
  0x23   :  { %v172_v27 = vsub.f32 1.0, %v171_v25 }
  0x25   :  { %151 = vmatpush.bf16.msra.mxu0 %v345_v24  ;;  %356 = vmatpush.bf16.msra.mxu1 %v345_v24  ;;  %v173_v30 = vmul.f32 %v376_v23, %v172_v27 }
  0x27   :  { %v174_v32 = vadd.f32 %v376_v23, %v173_v30 }
  0x29   :  { %152 = vmatpush.bf16.msra.mxu0 %v344_v29  ;;  %357 = vmatpush.bf16.msra.mxu1 %v344_v29  ;;  %v178_v34 = vsel %vm177_vm2, %v376_v23, %v174_v32 }
  0x2a   :  { %v183_v35 = vsel %vm180_vm3, %v182_v31, %v178_v34 }
  0x2b   :  { %v210_v36 = vsub.f32 1.0, %v183_v35  ;;  %v186_v37 = vrot.slane %v183_v35, 1  ;;  %v228_v43 = vperm.slane %v183_v35, 0 }
  0x2d   :  { %153 = vmatpush.bf16.msra.mxu0 %v343_v33  ;;  %358 = vmatpush.bf16.msra.mxu1 %v343_v33  ;;  %v214_v40 = vperm.slane %v210_v36, 0  ;;  %v211_v41 = vsub.f32 1.0, %v186_v37  ;;  %v229_v45 = vperm.slane %v186_v37, 0 }
  0x2f   :  { %217 = vperm.xlu2 %368, %v214_v40   ;;  %v215_v42 = vperm.slane %v211_v41, 0 }
  0x30   :  { %154 = vmatmul.bf16.vlgmr.msra.gmra.mxu0 %v341_v38  ;;  %159 = vmatmul.bf16.vlgmr.msra.gmra.mxu1 %v342_v39 }
  0x37   :  { %221 = vperm.xlu2 %368, %v215_v42  }
  0x86   :  { %v203_v44 = vpop.xlane.xlu0 %202 }
  0x87   :  { %v232_v46 = vmul.f32 %v228_v43, %v203_v44 }
  0x89   :  { %v207_v47 = vpop.xlane.xlu1 %206  ;;  %239 = vperm.xlu0 %369, %v232_v46   ;;  %v218_v53 = vpop.permute.xlu2 %217 }
  0x8a   :  { %v234_v48 = vmul.f32 %v229_v45, %v207_v47 }
  0x8c   :  { %249 = vperm.xlu2 %368, %v234_v48  }
  0x8e   :  { %v205_v49 = vpop.xlane.xlu0 %204 }
  0x8f   :  { %v233_v50 = vmul.f32 %v228_v43, %v205_v49 }
  0x91   :  { %v209_v51 = vpop.xlane.xlu1 %208  ;;  %244 = vperm.xlu1 %370, %v233_v50   ;;  %v222_v54 = vpop.permute.xlu2 %221 }
  0x92   :  { %v235_v52 = vmul.f32 %v229_v45, %v209_v51 }
  0x94   :  { %254 = vperm.xlu2 %368, %v235_v52  }
  0xad   :  { %v160_v55 = vpop.f32.mrf.mxu1  ;;  %v155_v5 = vpop.f32.mrf.mxu0 }
  0xae   :  { %v226_v57 = vmul.f32 %v222_v54, %v160_v55  ;;  %v224_v7 = vmul.f32 %v218_v53, %v155_v5 }
  0xb5   :  { %v162_v63 = vpop.f32.mrf.mxu1  ;;  %v157_v11 = vpop.f32.mrf.mxu0 }
  0xb6   :  { %v227_v1 = vmul.f32 %v222_v54, %v162_v63  ;;  %v225_v13 = vmul.f32 %v218_v53, %v157_v11 }
  0xe6   :  { %v250_v58 = vpop.permute.xlu2 %249 }
  0xe7   :  { %v262_v60 = vmul.f32 %v371_v56, %v250_v58 }
  0xe9   :  { %v266_v61 = vadd.f32 %v262_v60, %v226_v57 }
  0xeb   :  { %v274_v62 = vadd.f32 %v372_v59, %v266_v61 }
  0xed   :  { %278 = vst [vmem:[#allocation8 + $0x10] sm:$0xff] %v274_v62 }
  0xee   :  { %v255_v0 = vpop.permute.xlu2 %254 }
  0xef   :  { %v263_v2 = vmul.f32 %v371_v56, %v255_v0 }
  0xf1   :  { %v267_v3 = vadd.f32 %v263_v2, %v227_v1 }
  0xf3   :  { %v275_v4 = vadd.f32 %v372_v59, %v267_v3 }
  0xf5   :  { %279 = vst [vmem:[#allocation8 + $0x18] sm:$0xff] %v275_v4 }
  0xfb   :  { %v240_v6 = vpop.permute.xlu0 %239 }
  0xfc   :  { %v260_v8 = vmul.f32 %v371_v56, %v240_v6 }
  0xfe   :  { %v264_v9 = vadd.f32 %v260_v8, %v224_v7 }
 0x100   :  { %v272_v10 = vadd.f32 %v372_v59, %v264_v9 }
 0x102   :  { %276 = vst [vmem:[#allocation8] sm:$0xff] %v272_v10 }
 0x103   :  { %v245_v12 = vpop.permute.xlu1 %244 }
 0x104   :  { %v261_v14 = vmul.f32 %v371_v56, %v245_v12 }
 0x106   :  { %v265_v15 = vadd.f32 %v261_v14, %v225_v13 }
 0x108   :  { %v273_v16 = vadd.f32 %v372_v59, %v265_v15 }
 0x10a   :  { %277 = vst [vmem:[#allocation8 + $0x8] sm:$0xff] %v273_v16 }
 0x10b   :  { %292 = dma.vmem_to_hbm [thread:$0]  %s285_s4, 512, %s287_s13, [#allocation4], %s486_s14, %s486_s14, %s487_s15  }
 0x10c   :  { %477 = dma.done.wait [#allocation4], 512  }
 0x10d   :  { %478 = vsyncadd [#allocation4], 4294966784 }
 0x10e   :  { %297 = vsyncpa [#allocation3], 1 }
 0x10f   :  { %298 = vsyncpa [#allocation6], 1 }
 0x110   :  { %299 = vsyncpa [#allocation4], 1 }

</bundles_post_ra>
